<compile_context>
chip_gen: v6e
topology: v6e:2x2x1
jax: 0.10.0
libtpu: 0.0.40
codegen_flags: <defaults>
</compile_context>

<pallas_src>
import functools
import math

import jax
import jax.numpy as jnp
import numpy as np
from jax import lax
from jax.experimental import pallas as pl
from jax.experimental.pallas import tpu as pltpu


# ----------------------------------------------------------------------------
# Kernel A: W1 projection + per-head "attention" mixing (b_tile batches/step).
# ----------------------------------------------------------------------------
def _attn_heads_kernel(x_ref, w1t_ref, b1_ref, o_ref, *, h, dh, T, d, b_tile,
                       compute_dtype, approx_recip):
    # x_ref:  (b_tile*T, d)  f32
    # w1t_ref:(d, 3d)        compute_dtype (pre-transposed in the wrapper)
    # b1_ref: (1, 3d)        f32
    # o_ref:  (b_tile, d, T) f32, head-major d axis.
    x = x_ref[...].astype(compute_dtype)
    w1t = w1t_ref[...]
    b1 = b1_ref[...]

    # Fused projection for all b_tile batch elements: (b_tile*T, 3d), f32 acc.
    xw = jnp.dot(x, w1t, preferred_element_type=jnp.float32) + b1

    # NOTE: the PyTorch module scales by sqrt(q.size(-1)) == sqrt(T) (sequence
    # length) and softmaxes over the *head-dim* axis -- reproduced exactly.
    scale = 1.0 / math.sqrt(T)

    slabs = []
    for bb in range(b_tile):                  # static, unrolled
        r0 = bb * T
        head_outs = []
        for hh in range(h):                   # static, unrolled
            q_h = xw[r0:r0 + T, hh * dh:(hh + 1) * dh]                  # (T, dh)
            k_h = xw[r0:r0 + T, d + hh * dh:d + (hh + 1) * dh]          # (T, dh)
            v_h = xw[r0:r0 + T, 2 * d + hh * dh:2 * d + (hh + 1) * dh]  # (T, dh)

            # w = q_h^T @ k_h / sqrt(T): contract over T, no materialized .T
            w = lax.dot_general(
                q_h.astype(compute_dtype), k_h.astype(compute_dtype),
                (((0,), (0,)), ((), ())),
                preferred_element_type=jnp.float32) * scale             # (dh, dh)

            # softmax over the last (head-dim) axis, f32 math
            w = w - jnp.max(w, axis=-1, keepdims=True)
            e = jnp.exp(w)
            p = e * pl.reciprocal(jnp.sum(e, axis=-1, keepdims=True),
                                  approx=approx_recip)

            # out_h = p @ v_h^T: contract over head-dim, no materialized .T
            out_h = lax.dot_general(
                p.astype(compute_dtype), v_h.astype(compute_dtype),
                (((1,), (1,)), ((), ())),
                preferred_element_type=jnp.float32)                     # (dh, T)
            head_outs.append(out_h)

        # head-major stacking: slab[hh*dh + dd, t] == torch out[b, hh, dd, t]
        slabs.append(jnp.concatenate(head_outs, axis=0))                # (d, T)

    # single full-block store instead of h (or b_tile*h) partial stores
    o_ref[...] = jnp.stack(slabs, axis=0).astype(o_ref.dtype)           # (b_tile, d, T)


# ----------------------------------------------------------------------------
# Kernel B: output linear  y = x @ W2^T + b2  (W2 pre-transposed, row-tiled).
# ----------------------------------------------------------------------------
def _linear_kernel(x_ref, w2t_ref, b2_ref, o_ref, *, compute_dtype):
    x = x_ref[...].astype(compute_dtype)
    o_ref[...] = (
        jnp.dot(x, w2t_ref[...], preferred_element_type=jnp.float32)
        + b2_ref[...]
    ).astype(o_ref.dtype)


# ----------------------------------------------------------------------------
# Wrapper
# ----------------------------------------------------------------------------
def _largest_divisor_leq(n, cap):
    cap = max(1, min(n, cap))
    for t in range(cap, 0, -1):
        if n % t == 0:
            return t
    return 1


def attn_forward(X, W1, b1, W2, b2, *, n_head, fast=False):
    B, T, d = X.shape
    h = n_head
    dh = d // h
    assert d % h == 0

    compute_dtype = jnp.bfloat16 if fast else jnp.float32

    # Pre-transpose the weights ONCE in XLA (no per-grid-step in-kernel .T)
    # and pre-cast them for the MXU.  Biases stay f32; activations stay f32 at
    # the kernel boundary and are cast in-kernel.
    W1T = jnp.asarray(W1).T.astype(compute_dtype)          # (d, 3d)
    W2T = jnp.asarray(W2).T.astype(compute_dtype)          # (d, d)
    b1_2d = jnp.asarray(b1).reshape(1, 3 * d).astype(jnp.float32)
    b2_2d = jnp.asarray(b2).reshape(1, d).astype(jnp.float32)

    # ---- Kernel A: batch-tiled fused W1 + heads ----------------------------
    # b_tile*T rows per projection matmul (fills the MXU M-dim), but keep
    # >=2 parallel grid steps when possible so both v7x TensorCores get work.
    b_tile = _largest_divisor_leq(B, max(1, 256 // max(T, 1)))
    if B // b_tile < 2 and b_tile > 1:
        b_tile = _largest_divisor_leq(B, max(1, b_tile // 2))
    rows = b_tile * T

    X2d = X.reshape(B * T, d).astype(jnp.float32)

    kernel_a = functools.partial(
        _attn_heads_kernel, h=h, dh=dh, T=T, d=d, b_tile=b_tile,
        compute_dtype=compute_dtype, approx_recip=fast)

    # NOTE(v7x): the grid-invariant W1T block is still double-buffered by the
    # pipeline; for large d, tile the 3d axis or raise vmem_limit_bytes.
    heads_out = pl.pallas_call(
        kernel_a,
        out_shape=jax.ShapeDtypeStruct((B, d, T), jnp.float32),
        grid_spec=pltpu.PrefetchScalarGridSpec(
            num_scalar_prefetch=0,
            grid=(B // b_tile,),
            in_specs=[
                pl.BlockSpec((rows, d), lambda i: (i, 0)),
                pl.BlockSpec((d, 3 * d), lambda i: (0, 0)),   # grid-invariant
                pl.BlockSpec((1, 3 * d), lambda i: (0, 0)),   # grid-invariant
            ],
            out_specs=pl.BlockSpec((b_tile, d, T), lambda i: (i, 0, 0)),
        ),
        compiler_params=pltpu.CompilerParams(
            dimension_semantics=("parallel",)),
    )(X2d, W1T, b1_2d)

    # ---- "cat": raw row-major reinterpretation (== torch .view) -----------
    # Must remain a reshape (flat reinterpretation), NOT a transpose.
    cat2d = heads_out.reshape(B * T, d)

    # ---- Kernel B: W2 linear on row tiles ----------------------------------
    n_rows = B * T
    tm = _largest_divisor_leq(n_rows, 512)
    if n_rows // tm < 2 and tm > 8:
        tm = _largest_divisor_leq(n_rows, max(8, tm // 2))

    kernel_b = functools.partial(_linear_kernel, compute_dtype=compute_dtype)
    y2d = pl.pallas_call(
        kernel_b,
        out_shape=jax.ShapeDtypeStruct((n_rows, d), jnp.float32),
        grid_spec=pltpu.PrefetchScalarGridSpec(
            num_scalar_prefetch=0,
            grid=(n_rows // tm,),
            in_specs=[
                pl.BlockSpec((tm, d), lambda i: (i, 0)),
                pl.BlockSpec((d, d), lambda i: (0, 0)),       # grid-invariant
                pl.BlockSpec((1, d), lambda i: (0, 0)),       # grid-invariant
            ],
            out_specs=pl.BlockSpec((tm, d), lambda i: (i, 0)),
        ),
        compiler_params=pltpu.CompilerParams(
            dimension_semantics=("parallel",)),
    )(cat2d, W2T, b2_2d)

    return y2d.reshape(B, T, d)


# ----------------------------------------------------------------------------
# Pure-JAX reference (mirrors the PyTorch module exactly)
# ----------------------------------------------------------------------------
def attn_reference(X, W1, b1, W2, b2, *, n_head):
    B, T, d = X.shape
    h = n_head
    dh = d // h
    Xp = X @ W1.T + b1
    Q, K, V = Xp[..., :d], Xp[..., d:2 * d], Xp[..., 2 * d:]

    def rshp(x, k=False):
        x = x.reshape(B, T, h, dh)
        return jnp.transpose(x, (0, 2, 1, 3)) if k else jnp.transpose(x, (0, 2, 3, 1))

    q, k_, v = rshp(Q), rshp(K, k=True), rshp(V)
    w = jnp.einsum('bhit,bhtj->bhij', q, k_) / math.sqrt(q.shape[-1])
    w = jax.nn.softmax(w, axis=-1)
    out = jnp.einsum('bhij,bhjt->bhit', w, v)      # (B, h, dh, T)
    cat = out.reshape(B, T, h * dh)                # raw view, like torch
    return cat @ W2.T + b2


# ----------------------------------------------------------------------------
# Main
# ----------------------------------------------------------------------------
if __name__ == "__main__":
    B, T = 2, 8
    n_embd, n_head = 32, 4
    d = n_embd

    key = jax.random.PRNGKey(0)
    kx, kw1, kb1, kw2, kb2 = jax.random.split(key, 5)

    X = jax.random.normal(kx, (B, T, d), dtype=jnp.float32)
    # Deterministic synthetic parameters (nn.Linear weight/bias conventions).
    W1 = jax.random.normal(kw1, (3 * d, d), dtype=jnp.float32) * 0.02
    b1 = jax.random.normal(kb1, (3 * d,), dtype=jnp.float32) * 0.02
    W2 = jax.random.normal(kw2, (d, d), dtype=jnp.float32) * 0.02
    b2 = jax.random.normal(kb2, (d,), dtype=jnp.float32) * 0.02

    ref = attn_reference(X, W1, b1, W2, b2, n_head=n_head)

    # Exact path: f32 MXU operands, exact reciprocal -> tight tolerance.
    fwd_exact = jax.jit(functools.partial(attn_forward, n_head=n_head, fast=False))
    out = jax.block_until_ready(fwd_exact(X, W1, b1, W2, b2))
    np.testing.assert_allclose(np.asarray(out), np.asarray(ref),
                               rtol=1e-4, atol=1e-4)

    # Fast path: bf16 MXU operands (f32 accumulation) + approx EUP reciprocal.
    fwd_fast = jax.jit(functools.partial(attn_forward, n_head=n_head, fast=True))
    out_fast = jax.block_until_ready(fwd_fast(X, W1, b1, W2, b2))
    np.testing.assert_allclose(np.asarray(out_fast), np.asarray(ref),
                               rtol=2e-2, atol=3e-3)

    print("KERNEL_OK")
</pallas_src>

<mosaic_0001>
module attributes {stable_mosaic.version = 11 : i64} {
  func.func @_linear_kernel(%arg0: i32, %arg1: memref<8x32xf32, #tpu.memory_space<vmem>>, %arg2: memref<32x32xf32, #tpu.memory_space<vmem>>, %arg3: memref<1x32xf32, #tpu.memory_space<vmem>>, %arg4: memref<8x32xf32, #tpu.memory_space<vmem>>) attributes {dimension_semantics = [#tpu.dimension_semantics<parallel>], iteration_bounds = array<i64: 2>, scalar_prefetch = 0 : i64, scratch_operands = 0 : i64, tpu.core_type = #tpu.core_type<tc>, window_params = [{transform_indices = @transform_0, window_bounds = array<i64: 8, 32>}, {pipeline_mode = #tpu.pipeline_mode<synchronous>, transform_indices = @transform_1, window_bounds = array<i64: 32, 32>}, {pipeline_mode = #tpu.pipeline_mode<synchronous>, transform_indices = @transform_2, window_bounds = array<i64: 1, 32>}, {transform_indices = @transform_3, window_bounds = array<i64: 8, 32>}]} {
    %c0 = arith.constant 0 : index
    %c0_0 = arith.constant 0 : index
    %0 = vector.load %arg1[%c0, %c0_0] : memref<8x32xf32, #tpu.memory_space<vmem>>, vector<8x32xf32>
    %c0_1 = arith.constant 0 : index
    %c0_2 = arith.constant 0 : index
    %1 = vector.load %arg2[%c0_1, %c0_2] : memref<32x32xf32, #tpu.memory_space<vmem>>, vector<32x32xf32>
    %cst = arith.constant dense<0.000000e+00> : vector<8x32xf32>
    %2 = tpu.matmul %0, %1, %cst {dimension_numbers = #tpu.dot_dimension_numbers<[1], [0], [0], [1], [0, 0, 1, 1], [], []>} : vector<8x32xf32>, vector<32x32xf32>, vector<8x32xf32> -> vector<8x32xf32>
    %c0_3 = arith.constant 0 : index
    %c0_4 = arith.constant 0 : index
    %3 = vector.load %arg3[%c0_3, %c0_4] : memref<1x32xf32, #tpu.memory_space<vmem>>, vector<1x32xf32>
    %4 = vector.broadcast %3 : vector<1x32xf32> to vector<8x32xf32>
    %5 = arith.addf %2, %4 : vector<8x32xf32>
    %c0_5 = arith.constant 0 : index
    %c0_6 = arith.constant 0 : index
    %6 = vector.load %arg4[%c0_5, %c0_6] : memref<8x32xf32, #tpu.memory_space<vmem>>, vector<8x32xf32>
    tpu.vector_store %arg4[%c0_5, %c0_6], %5 {strides = array<i32>} : memref<8x32xf32, #tpu.memory_space<vmem>>, vector<8x32xf32>,
    return
  }
  func.func @transform_0(%arg0: i32) -> (i32, i32) {
    %c0_i32 = arith.constant 0 : i32
    %c0_i32_0 = arith.constant 0 : i32
    return %arg0, %c0_i32 : i32, i32
  }
  func.func @transform_1(%arg0: i32) -> (i32, i32) {
    %c0_i32 = arith.constant 0 : i32
    %c0_i32_0 = arith.constant 0 : i32
    %c0_i32_1 = arith.constant 0 : i32
    return %c0_i32, %c0_i32_0 : i32, i32
  }
  func.func @transform_2(%arg0: i32) -> (i32, i32) {
    %c0_i32 = arith.constant 0 : i32
    %c0_i32_0 = arith.constant 0 : i32
    %c0_i32_1 = arith.constant 0 : i32
    return %c0_i32, %c0_i32_0 : i32, i32
  }
  func.func @transform_3(%arg0: i32) -> (i32, i32) {
    %c0_i32 = arith.constant 0 : i32
    %c0_i32_0 = arith.constant 0 : i32
    return %arg0, %c0_i32 : i32, i32
  }
}

module attributes {stable_mosaic.version = 11 : i64} {
  func.func @_attn_heads_kernel(%arg0: i32, %arg1: memref<8x32xf32, #tpu.memory_space<vmem>>, %arg2: memref<32x96xf32, #tpu.memory_space<vmem>>, %arg3: memref<1x96xf32, #tpu.memory_space<vmem>>, %arg4: memref<1x32x8xf32, #tpu.memory_space<vmem>>) attributes {dimension_semantics = [#tpu.dimension_semantics<parallel>], iteration_bounds = array<i64: 2>, scalar_prefetch = 0 : i64, scratch_operands = 0 : i64, tpu.core_type = #tpu.core_type<tc>, window_params = [{transform_indices = @transform_0, window_bounds = array<i64: 8, 32>}, {pipeline_mode = #tpu.pipeline_mode<synchronous>, transform_indices = @transform_1, window_bounds = array<i64: 32, 96>}, {pipeline_mode = #tpu.pipeline_mode<synchronous>, transform_indices = @transform_2, window_bounds = array<i64: 1, 96>}, {transform_indices = @transform_3, window_bounds = array<i64: 1, 32, 8>}]} {
    %c0 = arith.constant 0 : index
    %c0_0 = arith.constant 0 : index
    %0 = vector.load %arg1[%c0, %c0_0] : memref<8x32xf32, #tpu.memory_space<vmem>>, vector<8x32xf32>
    %c0_1 = arith.constant 0 : index
    %c0_2 = arith.constant 0 : index
    %1 = vector.load %arg2[%c0_1, %c0_2] : memref<32x96xf32, #tpu.memory_space<vmem>>, vector<32x96xf32>
    %c0_3 = arith.constant 0 : index
    %c0_4 = arith.constant 0 : index
    %2 = vector.load %arg3[%c0_3, %c0_4] : memref<1x96xf32, #tpu.memory_space<vmem>>, vector<1x96xf32>
    %cst = arith.constant dense<0.000000e+00> : vector<8x96xf32>
    %3 = tpu.matmul %0, %1, %cst {dimension_numbers = #tpu.dot_dimension_numbers<[1], [0], [0], [1], [0, 0, 1, 1], [], []>} : vector<8x32xf32>, vector<32x96xf32>, vector<8x96xf32> -> vector<8x96xf32>
    %4 = vector.broadcast %2 : vector<1x96xf32> to vector<8x96xf32>
    %5 = arith.addf %3, %4 : vector<8x96xf32>
    %6 = vector.extract_strided_slice %5 {offsets = [0, 0], sizes = [8, 8], strides = [1, 1]} : vector<8x96xf32> to vector<8x8xf32>
    %7 = vector.extract_strided_slice %5 {offsets = [0, 32], sizes = [8, 8], strides = [1, 1]} : vector<8x96xf32> to vector<8x8xf32>
    %8 = vector.extract_strided_slice %5 {offsets = [0, 64], sizes = [8, 8], strides = [1, 1]} : vector<8x96xf32> to vector<8x8xf32>
    %cst_5 = arith.constant dense<0.000000e+00> : vector<8x8xf32>
    %9 = tpu.matmul %6, %7, %cst_5 {dimension_numbers = #tpu.dot_dimension_numbers<[0], [0], [1], [1], [0, 1, 1, 1], [], []>} : vector<8x8xf32>, vector<8x8xf32>, vector<8x8xf32> -> vector<8x8xf32>
    %cst_6 = arith.constant 0.353553385 : f32
    %10 = vector.broadcast %cst_6 : f32 to vector<8x8xf32>
    %11 = arith.mulf %9, %10 : vector<8x8xf32>
    %cst_7 = arith.constant dense<0xFF800000> : vector<8xf32>
    %12 = vector.multi_reduction <maximumf>, %11, %cst_7 [1] : vector<8x8xf32> to vector<8xf32>
    %13 = vector.shape_cast %12 : vector<8xf32> to vector<8x1xf32>
    %14 = vector.broadcast %13 : vector<8x1xf32> to vector<8x8xf32>
    %15 = arith.subf %11, %14 : vector<8x8xf32>
    %16 = math.exp %15 : vector<8x8xf32>
    %cst_8 = arith.constant dense<0.000000e+00> : vector<8xf32>
    %17 = vector.multi_reduction <add>, %16, %cst_8 [1] : vector<8x8xf32> to vector<8xf32>
    %18 = vector.shape_cast %17 : vector<8xf32> to vector<8x1xf32>
    %19 = tpu.reciprocal %18 : vector<8x1xf32> -> vector<8x1xf32>
    %20 = vector.broadcast %19 : vector<8x1xf32> to vector<8x8xf32>
    %21 = arith.mulf %16, %20 : vector<8x8xf32>
    %cst_9 = arith.constant dense<0.000000e+00> : vector<8x8xf32>
    %22 = tpu.matmul %21, %8, %cst_9 {dimension_numbers = #tpu.dot_dimension_numbers<[1], [1], [0], [0], [0, 0, 1, 0], [], []>} : vector<8x8xf32>, vector<8x8xf32>, vector<8x8xf32> -> vector<8x8xf32>
    %23 = vector.extract_strided_slice %5 {offsets = [0, 8], sizes = [8, 8], strides = [1, 1]} : vector<8x96xf32> to vector<8x8xf32>
    %24 = vector.extract_strided_slice %5 {offsets = [0, 40], sizes = [8, 8], strides = [1, 1]} : vector<8x96xf32> to vector<8x8xf32>
    %25 = vector.extract_strided_slice %5 {offsets = [0, 72], sizes = [8, 8], strides = [1, 1]} : vector<8x96xf32> to vector<8x8xf32>
    %cst_10 = arith.constant dense<0.000000e+00> : vector<8x8xf32>
    %26 = tpu.matmul %23, %24, %cst_10 {dimension_numbers = #tpu.dot_dimension_numbers<[0], [0], [1], [1], [0, 1, 1, 1], [], []>} : vector<8x8xf32>, vector<8x8xf32>, vector<8x8xf32> -> vector<8x8xf32>
    %cst_11 = arith.constant 0.353553385 : f32
    %27 = vector.broadcast %cst_11 : f32 to vector<8x8xf32>
    %28 = arith.mulf %26, %27 : vector<8x8xf32>
    %cst_12 = arith.constant dense<0xFF800000> : vector<8xf32>
    %29 = vector.multi_reduction <maximumf>, %28, %cst_12 [1] : vector<8x8xf32> to vector<8xf32>
    %30 = vector.shape_cast %29 : vector<8xf32> to vector<8x1xf32>
    %31 = vector.broadcast %30 : vector<8x1xf32> to vector<8x8xf32>
    %32 = arith.subf %28, %31 : vector<8x8xf32>
    %33 = math.exp %32 : vector<8x8xf32>
    %cst_13 = arith.constant dense<0.000000e+00> : vector<8xf32>
    %34 = vector.multi_reduction <add>, %33, %cst_13 [1] : vector<8x8xf32> to vector<8xf32>
    %35 = vector.shape_cast %34 : vector<8xf32> to vector<8x1xf32>
    %36 = tpu.reciprocal %35 : vector<8x1xf32> -> vector<8x1xf32>
    %37 = vector.broadcast %36 : vector<8x1xf32> to vector<8x8xf32>
    %38 = arith.mulf %33, %37 : vector<8x8xf32>
    %cst_14 = arith.constant dense<0.000000e+00> : vector<8x8xf32>
    %39 = tpu.matmul %38, %25, %cst_14 {dimension_numbers = #tpu.dot_dimension_numbers<[1], [1], [0], [0], [0, 0, 1, 0], [], []>} : vector<8x8xf32>, vector<8x8xf32>, vector<8x8xf32> -> vector<8x8xf32>
    %40 = vector.extract_strided_slice %5 {offsets = [0, 16], sizes = [8, 8], strides = [1, 1]} : vector<8x96xf32> to vector<8x8xf32>
    %41 = vector.extract_strided_slice %5 {offsets = [0, 48], sizes = [8, 8], strides = [1, 1]} : vector<8x96xf32> to vector<8x8xf32>
    %42 = vector.extract_strided_slice %5 {offsets = [0, 80], sizes = [8, 8], strides = [1, 1]} : vector<8x96xf32> to vector<8x8xf32>
    %cst_15 = arith.constant dense<0.000000e+00> : vector<8x8xf32>
    %43 = tpu.matmul %40, %41, %cst_15 {dimension_numbers = #tpu.dot_dimension_numbers<[0], [0], [1], [1], [0, 1, 1, 1], [], []>} : vector<8x8xf32>, vector<8x8xf32>, vector<8x8xf32> -> vector<8x8xf32>
    %cst_16 = arith.constant 0.353553385 : f32
    %44 = vector.broadcast %cst_16 : f32 to vector<8x8xf32>
    %45 = arith.mulf %43, %44 : vector<8x8xf32>
    %cst_17 = arith.constant dense<0xFF800000> : vector<8xf32>
    %46 = vector.multi_reduction <maximumf>, %45, %cst_17 [1] : vector<8x8xf32> to vector<8xf32>
    %47 = vector.shape_cast %46 : vector<8xf32> to vector<8x1xf32>
    %48 = vector.broadcast %47 : vector<8x1xf32> to vector<8x8xf32>
    %49 = arith.subf %45, %48 : vector<8x8xf32>
    %50 = math.exp %49 : vector<8x8xf32>
    %cst_18 = arith.constant dense<0.000000e+00> : vector<8xf32>
    %51 = vector.multi_reduction <add>, %50, %cst_18 [1] : vector<8x8xf32> to vector<8xf32>
    %52 = vector.shape_cast %51 : vector<8xf32> to vector<8x1xf32>
    %53 = tpu.reciprocal %52 : vector<8x1xf32> -> vector<8x1xf32>
    %54 = vector.broadcast %53 : vector<8x1xf32> to vector<8x8xf32>
    %55 = arith.mulf %50, %54 : vector<8x8xf32>
    %cst_19 = arith.constant dense<0.000000e+00> : vector<8x8xf32>
    %56 = tpu.matmul %55, %42, %cst_19 {dimension_numbers = #tpu.dot_dimension_numbers<[1], [1], [0], [0], [0, 0, 1, 0], [], []>} : vector<8x8xf32>, vector<8x8xf32>, vector<8x8xf32> -> vector<8x8xf32>
    %57 = vector.extract_strided_slice %5 {offsets = [0, 24], sizes = [8, 8], strides = [1, 1]} : vector<8x96xf32> to vector<8x8xf32>
    %58 = vector.extract_strided_slice %5 {offsets = [0, 56], sizes = [8, 8], strides = [1, 1]} : vector<8x96xf32> to vector<8x8xf32>
    %59 = vector.extract_strided_slice %5 {offsets = [0, 88], sizes = [8, 8], strides = [1, 1]} : vector<8x96xf32> to vector<8x8xf32>
    %cst_20 = arith.constant dense<0.000000e+00> : vector<8x8xf32>
    %60 = tpu.matmul %57, %58, %cst_20 {dimension_numbers = #tpu.dot_dimension_numbers<[0], [0], [1], [1], [0, 1, 1, 1], [], []>} : vector<8x8xf32>, vector<8x8xf32>, vector<8x8xf32> -> vector<8x8xf32>
    %cst_21 = arith.constant 0.353553385 : f32
    %61 = vector.broadcast %cst_21 : f32 to vector<8x8xf32>
    %62 = arith.mulf %60, %61 : vector<8x8xf32>
    %cst_22 = arith.constant dense<0xFF800000> : vector<8xf32>
    %63 = vector.multi_reduction <maximumf>, %62, %cst_22 [1] : vector<8x8xf32> to vector<8xf32>
    %64 = vector.shape_cast %63 : vector<8xf32> to vector<8x1xf32>
    %65 = vector.broadcast %64 : vector<8x1xf32> to vector<8x8xf32>
    %66 = arith.subf %62, %65 : vector<8x8xf32>
    %67 = math.exp %66 : vector<8x8xf32>
    %cst_23 = arith.constant dense<0.000000e+00> : vector<8xf32>
    %68 = vector.multi_reduction <add>, %67, %cst_23 [1] : vector<8x8xf32> to vector<8xf32>
    %69 = vector.shape_cast %68 : vector<8xf32> to vector<8x1xf32>
    %70 = tpu.reciprocal %69 : vector<8x1xf32> -> vector<8x1xf32>
    %71 = vector.broadcast %70 : vector<8x1xf32> to vector<8x8xf32>
    %72 = arith.mulf %67, %71 : vector<8x8xf32>
    %cst_24 = arith.constant dense<0.000000e+00> : vector<8x8xf32>
    %73 = tpu.matmul %72, %59, %cst_24 {dimension_numbers = #tpu.dot_dimension_numbers<[1], [1], [0], [0], [0, 0, 1, 0], [], []>} : vector<8x8xf32>, vector<8x8xf32>, vector<8x8xf32> -> vector<8x8xf32>
    %74 = tpu.concatenate %22, %39, %56, %73 in 0 : vector<8x8xf32>, vector<8x8xf32>, vector<8x8xf32>, vector<8x8xf32> -> vector<32x8xf32>
    %75 = vector.shape_cast %74 : vector<32x8xf32> to vector<1x32x8xf32>
    %c0_25 = arith.constant 0 : index
    %c0_26 = arith.constant 0 : index
    %c0_27 = arith.constant 0 : index
    %76 = vector.load %arg4[%c0_25, %c0_26, %c0_27] : memref<1x32x8xf32, #tpu.memory_space<vmem>>, vector<1x32x8xf32>
    tpu.vector_store %arg4[%c0_25, %c0_26, %c0_27], %75 {strides = array<i32>} : memref<1x32x8xf32, #tpu.memory_space<vmem>>, vector<1x32x8xf32>,
    return
  }
  func.func @transform_0(%arg0: i32) -> (i32, i32) {
    %c0_i32 = arith.constant 0 : i32
    %c0_i32_0 = arith.constant 0 : i32
    return %arg0, %c0_i32 : i32, i32
  }
  func.func @transform_1(%arg0: i32) -> (i32, i32) {
    %c0_i32 = arith.constant 0 : i32
    %c0_i32_0 = arith.constant 0 : i32
    %c0_i32_1 = arith.constant 0 : i32
    return %c0_i32, %c0_i32_0 : i32, i32
  }
  func.func @transform_2(%arg0: i32) -> (i32, i32) {
    %c0_i32 = arith.constant 0 : i32
    %c0_i32_0 = arith.constant 0 : i32
    %c0_i32_1 = arith.constant 0 : i32
    return %c0_i32, %c0_i32_0 : i32, i32
  }
  func.func @transform_3(%arg0: i32) -> (i32, i32, i32) {
    %c0_i32 = arith.constant 0 : i32
    %c0_i32_0 = arith.constant 0 : i32
    %c0_i32_1 = arith.constant 0 : i32
    return %arg0, %c0_i32, %c0_i32_0 : i32, i32, i32
  }
}

</mosaic_0001>

<bundles_post_ra>
// kernel: attn_forward.3
= control target key start
LH: loop header
LB: loop body
LE: loop exit
PB: predicated region body
PF: predicated region fallthrough
CT: control target
= control target key end

     0   :  { %8 = vsyncpa [#allocation3], 0  ;;  %s588_s0 = inlined_call_operand.vmem [shape: f32[16,32], index: 0, kind: input, shape index: {}]   ;;  %s589_s1 = inlined_call_operand.vmem [shape: f32[32,32], index: 1, kind: input, shape index: {}]   ;;  %s590_s2 = inlined_call_operand.vmem [shape: f32[1,32], index: 2, kind: input, shape index: {}]   ;;  %s591_s3 = inlined_call_operand.hbm [shape: f32[16,32], index: 3, kind: output, shape index: {}]  }
   0x1   :  { %10 = vsyncpa [#allocation3 + $0x1], 0  ;;  %s480_s12 = smov 0   ;;  %s482_s13 = smov 0  }
   0x2   :  { %s484_s14 = smov 0   ;;  %s486_s15 = smov 0  }
   0x3 LB: > { %s501_s16 = sadd.s32 4294967295, %s455_s15   ;;  %s326_s17 = sadd.s32 4294967294, %s455_s15   ;;  %s455_s15 = sphi %s486_s15, %s597_s15   ;;  %s451_s14 = sphi %s484_s14, %s596_s14   ;;  %s447_s13 = sphi %s482_s13, %s595_s13   ;;  %s443_s12 = sphi %s480_s12, %s594_s12  }
   0x4   : > { %s505_s18 = sadd.s32 1, %s455_s15   ;;  %s91_s19 = sadd.s32 1, %s451_s14 }
   0x5   : > { %s88_s20 = ssub.s32 %s455_s15, %s505_s18  ;;  %p101_p0 = scmp.ne.s32.totalorder %s451_s14, %s447_s13 }
   0x6   : > { %p89_p1 = scmp.eq.s32.totalorder %s88_s20, 0  ;;  %p102_p2 = scmp.eq.s32.totalorder %s501_s16, 1 }
   0x7   : > { %p107_p3 = scmp.ne.s32.totalorder %s447_s13, %s443_s12  ;;  %p108_p4 = scmp.eq.s32.totalorder %s326_s17, 1 }
   0x8   : > { %s516_s21 = scalar_select %p89_p1, %s451_s14, %s91_s19  }
   0x9   : > { %p518_p5 = por %p102_p2, %p101_p0  ;;  %p522_p6 = por %p108_p4, %p107_p3 }
   0xa   : > { %p329_p7 = scmp.ge.s32.totalorder %s455_s15, 1  ;;  %p139_p8 = scmp.lt.s32.totalorder %s455_s15, 3 }
   0xc   : > { %p140_p9 = pnand %p329_p7, %p139_p8 }
   0xd   : > { %p162_p10 = scmp.lt.s32.totalorder (!%p140_p9), %s501_s16, 1  ;;  %s159_s10 = sand.u32 (!%p140_p9), 1, %s447_s13  }
   0xe   : > { %143 = sbr.rel (%p140_p9) target bundleno = 236 (0xec), region = 32  ;;  %s330_s11 = sshll.u32 (!%p140_p9), %s159_s10, 3 }
   0xf   : > { %s335_s20 = sshll.u32 (!%p140_p9), %s501_s16, 7  ;;  %s161_s24 = scalar_lea.vmem (!%p140_p9), [#allocation2], %s330_s11 }
  0x10   : > { %s267_s25 = sshll.u32 (!%p140_p9), %s161_s24, 4  ;;  %s254_s29 = scalar_lea.sflag (!%p140_p9), [#allocation3], %s159_s10  ;;  %s268_s25 = int_to_ptr.vmem [resolvable:$true] %s267_s25 }
  0x11   : > { %s395_s30 = scalar_lea.vmem (!%p140_p9), %s268_s25, 128 }
  0x12   : > { %p396_p11 = scmp.ne.s32.totalorder (!%p140_p9), %s268_s25, %s395_s30 }
  0x13   : > { %v170_v0 = vld [vmem:[%s589_s1 + $0x18] sm:$0xff]  ;;  %v457_v1 = vmov 0.0   ;;  %v169_v2 = vld [vmem:[%s589_s1 + $0x10] sm:$0xff]  ;;  %vm458_vm0 = vmmov 0   ;;  %s163_s28 = scalar_select %p162_p10, %s501_s16, 1  ;;  %v168_v3 = vld [vmem:[%s589_s1 + $0x8] sm:$0xff] }
  0x14   : > { %343 = vmatprep.subr.mxu0 %v457_v1  ;;  %351 = vmatprep.mubr.msk.f32.mxu0 %vm458_vm0, %v457_v1  ;;  %v167_v4 = vld [vmem:[%s589_s1] sm:$0xff]  ;;  %vm178_vm1 = vcmask 261120   ;;  %p397_p12 = pnand %p396_p11, %p518_p5 }
  0x15   : > { %344 = vmatpush3.msra.mxu0 %v170_v0  ;;  %s331_s4 = sshll.u32 %s163_s28, 3  ;;  %v332_v6 = vld [vmem:[%s590_s2] ss:$0 sm:$0xff]  ;;  %s553_s28 = scalar_lea.hbm %s591_s3, %s335_s20 }
  0x16   : > { %345 = vmatprep.subr.mxu0 %v457_v1  ;;  %s165_s9 = scalar_lea.vmem %s588_s0, %s331_s4  ;;  %p398_p13 = pneg %p397_p12 }
  0x17   : > { %346 = vmatpush3.msra.mxu0 %v169_v2  ;;  %v166_v5 = vld [vmem:[%s165_s9] sm:$0xff]  ;;  %s459_s4 = smov [#allocation2]  }
  0x18   : > { %347 = vmatprep.subr.mxu0 %v457_v1  ;;  %s399_s16 = sshll.u32 %s459_s4, 4  ;;  %s400_s16 = int_to_ptr.vmem [resolvable:$false] %s399_s16 }
  0x19   : > { %348 = vmatpush3.msra.mxu0 %v168_v3  ;;  %s401_s5 = scalar_lea.vmem %s400_s16, 256  ;;  %p402_p0 = scmp.lt.s32.totalorder %s268_s25, %s400_s16 }
  0x1a   : > { %349 = vmatprep.subr.mxu0 %v457_v1  ;;  %p403_p1 = scmp.lt.s32.totalorder %s401_s5, %s395_s30 }
  0x1b   : > { %350 = vmatpush3.msra.mxu0 %v167_v4 }
  0x1c   : > { %352 = vmatmul.mubr.msk.f32.vlgmr.msra.gmra.mxu0 %vm178_vm1, %v166_v5  ;;  %p404_p2 = por %p403_p1, %p402_p0 }
  0x1e   : > { %p405_p3 = pnand %p404_p2, %p398_p13 }
  0xdc   : > { %v248_v7 = vpop.f32.mrf.mxu0 }
  0xdd   : > { %v249_v8 = vadd.f32 %v332_v6, %v248_v7 }
  0xde   : > { %v353_v9 = vpop.f32.mrf.mxu0 }
  0xdf   : > { %252 = vst.msk [vmem:[%s161_s24] sm:$0xff] %vm178_vm1, %v249_v8 }
  0xe0   : > { %408 = shalt.err (!%p405_p3)
}
  0xe1   : > { %s409_s6 = scalar_lea.hbm %s553_s28, 128  ;;  %s413_s9 = scalar_lea.hbm %s591_s3, 256 }
  0xe2   : > { %p410_p4 = scmp.ne.s32.totalorder %s553_s28, %s409_s6  ;;  %p414_p9 = scmp.lt.s32.totalorder %s553_s28, %s591_s3 }
  0xe3   : > { %p415_p10 = scmp.lt.s32.totalorder %s413_s9, %s409_s6 }
  0xe4   : > { %p411_p7 = pnand %p410_p4, %p518_p5 }
  0xe5   : > { %p416_p11 = por %p415_p10, %p414_p9 }
  0xe6   : > { %p412_p8 = pneg %p411_p7 }
  0xe8   : > { %p417_p12 = pnand %p416_p11, %p412_p8 }
  0xea   : > { %420 = shalt.err (!%p417_p12)
}
  0xeb   : > { %354 = dma.vmem_to_hbm [thread:$0]  (%p518_p5), %s268_s25, 128, %s553_s28, %s254_s29  }
  0xec PF: > { %p360_p13 = scmp.ge.s32.totalorder %s455_s15, 2  ;;  %s279_s17 = sand.u32 1, %s443_s12  }
  0xed   : > { %s280_s19 = scalar_lea.sflag [#allocation3], %s279_s17 }
  0xee   : > { %p357_p0 = pnand %p360_p13, %p522_p6 }
  0xf0   : > { %p358_p1 = pneg %p357_p0 }
  0xf2   : > { %438 = dma.done.wait (%p358_p1), %s280_s19, 128  }
  0xf3   : > { %440 = vsyncadd (%p358_p1), %s280_s19, 4294967168  ;;  %p13_p2 = scmp.ge.s32.totalorder %s505_s18, 4   ;;  %s594_s12 = smov %s447_s13 }
  0xf4   : > { %s595_s13 = smov %s451_s14  ;;  %s596_s14 = smov %s516_s21 }
  0xf5   : > { %s597_s15 = smov %s505_s18  ;;  %15 = sbr.rel (!%p13_p2) target bundleno = 3 (0x3), region = 67 }
  0xfa   :  { %285 = vsyncpa [#allocation3], 1 }
  0xfb   :  { %287 = vsyncpa [#allocation3 + $0x1], 1 }

// kernel: attn_forward.2
= control target key start
LH: loop header
LB: loop body
LE: loop exit
PB: predicated region body
PF: predicated region fallthrough
CT: control target
= control target key end

     0   :  { %8 = vsyncpa [#allocation3], 0  ;;  %s1675_s0 = inlined_call_operand.hbm [shape: f32[16,32], index: 0, kind: input, shape index: {}]   ;;  %s1676_s1 = inlined_call_operand.hbm [shape: f32[32,96], index: 1, kind: input, shape index: {}]   ;;  %s1677_s2 = inlined_call_operand.vmem [shape: f32[1,96], index: 2, kind: input, shape index: {}]   ;;  %s1678_s3 = inlined_call_operand.vmem [shape: f32[2,32,8], index: 3, kind: output, shape index: {}]  }
   0x1   :  { %10 = vsyncpa [#allocation3 + $0x1], 0 }
   0x2   :  { %11 = vsyncpa [#allocation5], 0  ;;  %s1481_s12 = smov 0   ;;  %s1483_s13 = smov 0  }
   0x3   :  { %s1485_s14 = smov 0   ;;  %s1487_s15 = smov 0  }
   0x4 LB: > { %s1500_s16 = sadd.s32 4294967295, %s1442_s15   ;;  %p37_p0 = scmp.ne.s32.totalorder %s1434_s13, %s1430_s12  ;;  %s1442_s15 = sphi %s1487_s15, %s1693_s15   ;;  %s1438_s14 = sphi %s1485_s14, %s1692_s14   ;;  %s1434_s13 = sphi %s1483_s13, %s1691_s13   ;;  %s1430_s12 = sphi %s1481_s12, %s1690_s12  }
   0x5   : > { %p1679_p1 = scmp.eq.s32.totalorder %s1500_s16, 0  ;;  %p1170_p2 = scmp.ge.s32.totalorder %s1442_s15, 1 }
   0x6   : > { %p116_p3 = scmp.lt.s32.totalorder %s1442_s15, 3  ;;  %s1444_s19 = smov [#allocation4]  }
   0x7   : > { %p1508_p4 = por %p1679_p1, %p37_p0  ;;  %s128_s20 = sshll.u32 %s1444_s19, 4  ;;  %s129_s20 = int_to_ptr.vmem [resolvable:$true] %s128_s20 }
   0x8   : > { %p1512_p5 = pnand %p1170_p2, %p116_p3  ;;  %s1525_s22 = sadd.s32 1, %s1442_s15  }
   0x9   : > { %s1682_s17 = scalar_select %p1508_p4, 1, 0 }
   0xa   : > { %s1683_s18 = scalar_select %p1512_p5, 1, 0 }
   0xb   : > { %p1275_p6 = pneg %p1512_p5  ;;  %s24_s23 = sadd.s32 1, %s1438_s14 }
   0xc   : > { %s21_s24 = ssub.s32 %s1442_s15, %s1525_s22  ;;  %s1361_s25 = scalar_lea.vmem %s129_s20, 512 }
   0xd   : > { %p1520_p7 = pnand %p1275_p6, %p1679_p1  ;;  %p1362_p9 = scmp.ne.s32.totalorder %s129_s20, %s1361_s25 }
   0xe   : > { %p1369_p12 = scmp.lt.s32.totalorder %s129_s20, %s129_s20  ;;  %p1370_p13 = scmp.lt.s32.totalorder %s1361_s25, %s1361_s25 }
   0xf   : > { %p1352_p8 = pneg %p1520_p7 }
  0x10   : > { %p1371_p0 = por %p1370_p13, %p1369_p12 }
  0x11   : > { %p1364_p10 = pnand %p1362_p9, %p1352_p8 }
  0x13   : > { %p1365_p11 = pneg %p1364_p10 }
  0x15   : > { %p1372_p2 = pnand %p1371_p0, %p1365_p11 }
  0x17   : > { %1375 = shalt.err (!%p1372_p2)
}
  0x18   : > { %s1445_s26 = smov 128   ;;  %s1446_s27 = smov 8  }
  0x19   : > { %1278 = dma.hbm_to_vmem [thread:$0]  (!%p1520_p7), %s1676_s1, 512, %s129_s20, [#allocation5], %s1445_s26, %s1445_s26, %s1446_s27  }
  0x1a   : > { %p22_p3 = scmp.eq.s32.totalorder %s21_s24, 0  ;;  %p31_p6 = scmp.ne.s32.totalorder %s1438_s14, %s1434_s13 }
  0x1b   : > { %p32_p8 = scmp.eq.s32.totalorder %s1442_s15, 0  ;;  %p1284_p9 = scmp.lt.s32.totalorder %s1442_s15, 2 }
  0x1c   : > { %s1542_s30 = scalar_select %p22_p3, %s1438_s14, %s24_s23  }
  0x1d   : > { %p33_p10 = por %p32_p8, %p31_p6  ;;  %s145_s4 = sand.u32 1, %s1438_s14  }
  0x1e   : > { %s1173_s5 = sshll.u32 %s145_s4, 3  ;;  %s1174_s6 = sshll.u32 %s1442_s15, 7 }
  0x1f   : > { %s1549_s9 = scalar_lea.hbm %s1675_s0, %s1174_s6  ;;  %s149_s10 = scalar_lea.vmem [#allocation2], %s1173_s5 }
  0x20   : > { %s156_s11 = sshll.u32 %s149_s10, 4  ;;  %p1551_p7 = pnand %p1284_p9, %p33_p10  ;;  %s157_s11 = int_to_ptr.vmem [resolvable:$true] %s156_s11 }
  0x21   : > { %s146_s19 = scalar_lea.sflag [#allocation3], %s145_s4  ;;  %s1376_s20 = scalar_lea.hbm %s1549_s9, 128 }
  0x22   : > { %p1377_p11 = scmp.ne.s32.totalorder %s1549_s9, %s1376_s20  ;;  %p1378_p12 = pneg %p1551_p7 }
  0x23   : > { %s1381_s23 = scalar_lea.hbm %s1675_s0, 256  ;;  %p1382_p2 = scmp.lt.s32.totalorder %s1549_s9, %s1675_s0 }
  0x24   : > { %p1379_p13 = pnand %p1378_p12, %p1377_p11  ;;  %p1383_p3 = scmp.lt.s32.totalorder %s1381_s23, %s1376_s20 }
  0x26   : > { %p1380_p0 = pneg %p1379_p13  ;;  %p1384_p6 = por %p1383_p3, %p1382_p2 }
  0x28   : > { %p1385_p8 = pnand %p1384_p6, %p1380_p0 }
  0x2a   : > { %1388 = shalt.err (!%p1385_p8)
}
  0x2b   : > { %s1389_s26 = scalar_lea.vmem %s157_s11, 128  ;;  %s1447_s27 = smov [#allocation2]  }
  0x2c   : > { %p1390_p9 = scmp.ne.s32.totalorder %s157_s11, %s1389_s26  ;;  %s1394_s28 = sshll.u32 %s1447_s27, 4  ;;  %s1395_s28 = int_to_ptr.vmem [resolvable:$false] %s1394_s28 }
  0x2d   : > { %s1396_s29 = scalar_lea.vmem %s1395_s28, 256  ;;  %p1397_p11 = scmp.lt.s32.totalorder %s157_s11, %s1395_s28 }
  0x2e   : > { %p1392_p10 = pnand %p1390_p9, %p1378_p12  ;;  %p1398_p13 = scmp.lt.s32.totalorder %s1396_s29, %s1389_s26 }
  0x30   : > { %p1393_p1 = pneg %p1392_p10  ;;  %p1399_p4 = por %p1398_p13, %p1397_p11 }
  0x32   : > { %p1400_p5 = pnand %p1399_p4, %p1393_p1 }
  0x34   : > { %1403 = shalt.err (!%p1400_p5)
}
  0x35   : > { %1282 = dma.hbm_to_vmem [thread:$0]  (!%p1551_p7), %s1549_s9, 128, %s157_s11, %s146_s19  }
  0x36   : > { %p1686_p0 = scmp.ne.s32.totalorder %s1683_s18, 0 }
  0x37   : > { %s167_s4 = sand.u32 (!%p1686_p0), 1, %s1434_s13   ;;  %p1687_p12 = scmp.ne.s32.totalorder (!%p1686_p0), %s1682_s17, 0 }
  0x38   : > { %165 = sbr.rel (%p1686_p0) target bundleno = 1716 (0x6b4), region = 32  ;;  %s1176_s5 = sshll.u32 (!%p1686_p0), %s167_s4, 3 }
  0x39   : > { %s168_s6 = scalar_lea.sflag (!%p1686_p0), [#allocation3], %s167_s4  ;;  %s171_s7 = scalar_lea.vmem (!%p1686_p0), [#allocation2], %s1176_s5 }
  0x3d   : > { %1421 = dma.done.wait (%p1687_p12), %s168_s6, 128  }
  0x3e   : > { %1423 = vsyncadd (%p1687_p12), %s168_s6, 4294967168  ;;  %p1688_p1 = scmp.eq.s32.totalorder %s1500_s16, 0 }
  0x40   : > { %1425 = dma.done.wait (%p1688_p1), [#allocation5], 512   ;;  %p1689_p4 = pmov %p1688_p1 }
  0x41   : > { %v1448_v0 = vmov 0.0   ;;  %vm1449_vm0 = vmmov 0   ;;  %v207_v1 = vld [vmem:[#allocation4 + $0x18] sm:$0xff]  ;;  %v206_v2 = vld [vmem:[#allocation4 + $0x10] sm:$0xff]  ;;  %v205_v3 = vld [vmem:[#allocation4 + $0x8] sm:$0xff]  ;;  %vm215_vm1 = vcmask 261120  }
  0x42   : > { %1427 = vsyncadd (%p1689_p4), [#allocation5], 4294966784  ;;  %1218 = vmatprep.subr.mxu0 %v1448_v0  ;;  %1226 = vmatprep.mubr.msk.f32.mxu0 %vm1449_vm0, %v1448_v0  ;;  %v204_v4 = vld [vmem:[#allocation4] sm:$0xff]  ;;  %v203_v5 = vld [vmem:[%s171_s7] sm:$0xff]  ;;  %s1450_s8 = smov 96   ;;  %s1451_s9 = smov 112  }
  0x43   : > { %1229 = vmatprep.subr.mxu1 %v1448_v0  ;;  %1231 = vmatprep.mubr.msk.f32.mxu1 %vm1449_vm0, %v1448_v0  ;;  %v1180_v6 = vld [vmem:[%s1677_s2] ss:$0 sm:$0xff]  ;;  %s1452_s10 = smov 88   ;;  %s1453_s11 = smov 72   ;;  %vm325_vm2 = vcmask 64512  }
  0x44   : > { %1219 = vmatpush3.msra.mxu0 %v207_v1  ;;  %s1454_s12 = smov 120   ;;  %s1455_s19 = smov 104  }
  0x45   : > { %1220 = vmatprep.subr.mxu0 %v1448_v0  ;;  %s1456_s20 = smov 64   ;;  %s1457_s15 = smov 80  }
  0x46   : > { %1221 = vmatpush3.msra.mxu0 %v206_v2  ;;  %p198_p5 = scmp.lt.s32.totalorder %s1500_s16, 1  ;;  %s1459_s26 = smov 56  }
  0x47   : > { %1222 = vmatprep.subr.mxu0 %v1448_v0  ;;  %s1460_s27 = smov 40  }
  0x48   : > { %1223 = vmatpush3.msra.mxu0 %v205_v3  ;;  %s1695_s16 = smov (!%p198_p5, %s1500_s16), 1 }
  0x49   : > { %1224 = vmatprep.subr.mxu0 %v1448_v0  ;;  %s1196_s21 = sshll.u32 %s1695_s16, 5  ;;  %s1458_s16 = smov 48  }
  0x4a   : > { %1225 = vmatpush3.msra.mxu0 %v204_v4  ;;  %s1631_s25 = scalar_lea.vmem %s1678_s3, %s1196_s21 }
  0x4b   : > { %1227 = vmatmul.mubr.msk.f32.vlgmr.msra.gmra.mxu0 %vm215_vm1, %v203_v5  ;;  %1244 = vmatprep.subr.mxu0 %v1448_v0 }
  0x4c   : > { %1246 = vmatprep.mubr.msk.f32.mxu0 %vm1449_vm0, %v1448_v0 }
 0x10b   : > { %v285_v7 = vpop.f32.mrf.mxu0 }
 0x10c   : > { %v1595_v8 = vadd.f32 %v1180_v6, %v285_v7 }
 0x10d   : > { %v1228_v9 = vpop.f32.mrf.mxu0 }
 0x10e   : > { %322 = vrot.lane.b32.xlu0 %v1595_v8, %s1450_s8 }
 0x12c   : > { %289 = vxpose.xlu0.b32.start.end [1/1] (short) (narrow) %v1595_v8, 8 }
 0x155   : > { %688 = vrot.lane.b32.xlu0 %v1595_v8, %s1451_s9 }
 0x159   : > { %523 = vrot.lane.b32.xlu0 %v1595_v8, %s1452_s10 }
 0x15d   : > { %923 = vrot.lane.b32.xlu0 %v1595_v8, %s1453_s11 }
 0x180   : > { %v323_v10 = vpop.permute.xlu0 %322 }
 0x181   : > { %1230 = vmatpush3.msra.mxu1 %v323_v10 }
 0x182   : > { %1234 = vmatprep.subr.mxu1 %v1448_v0 }
 0x1a8   : > { %v305_v11 = vpop.trf.xlu0 }
 0x1a9   : > { %1232 = vmatmul.mubr.msk.f32.vlgmr.msra.gmra.mxu1 %vm325_vm2, %v305_v11 }
 0x1aa   : > { %1236 = vmatprep.mubr.msk.f32.mxu1 %vm1449_vm0, %v1448_v0 }
 0x1c7   : > { %v689_v12 = vpop.permute.xlu0 %688 }
 0x1c8   : > { %691 = vxpose.xlu0.b32.start.end [1/1] (short) (narrow) %v689_v12, 8 }
 0x1cb   : > { %v524_v28 = vpop.permute.xlu0 %523 }
 0x1cf   : > { %v924_v29 = vpop.permute.xlu0 %923 }
 0x244   : > { %v707_v32 = vpop.trf.xlu0 }
 0x269   : > { %v395_v13 = vpop.f32.mrf.mxu1 }
 0x26a   : > { %v399_v14 = vmul.f32 0.35355338, %v395_v13 }
 0x26b   : > { %v1233_v15 = vpop.f32.mrf.mxu1 }
 0x26c   : > { %v400_v16 = vsel %vm325_vm2, %v399_v14, -inf }
 0x26d   : > { %401 = vmax.xlane.f32.xlu1 %v400_v16 }
 0x27e   : > { %488 = vrot.lane.b32.xlu1 %v1595_v8, %s1454_s12 }
 0x282   : > { %888 = vrot.lane.b32.xlu1 %v1595_v8, %s1455_s19 }
 0x286   : > { %411 = vrot.lane.b32.xlu1 %v1595_v8, %s1456_s20 }
 0x2f6   : > { %v402_v17 = vpop.xlane.xlu1 %401 }
 0x2f7   : > { %v403_v18 = vsub.f32 %v399_v14, %v402_v17 }
 0x2f9   : > { %v404_v19 = vmul.f32 1.442695, %v403_v18 }
 0x2fa   : > { %v489_v20 = vpop.permute.xlu1 %488 }
 0x2fb   : > { %1334 = vpow2.f32 %v404_v19 }
 0x2fe   : > { %v889_v21 = vpop.permute.xlu1 %888 }
 0x2ff   : > { %891 = vxpose.xlu0.b32.start.end [1/1] (short) (narrow) %v889_v21, 8 }
 0x302   : > { %v412_v22 = vpop.permute.xlu1 %411 }
 0x303   : > { %1235 = vmatpush3.xpose.msk.msra.mxu1 %vm325_vm2, %v412_v22 }
 0x304   : > { %1239 = vmatprep.subr.mxu1 %v1448_v0 }
 0x308   : > { %v1335_v23 = vpop.eup %1334 }
 0x309   : > { %v406_v24 = vsel %vm325_vm2, %v1335_v23, 0.0 }
 0x30a   : > { %407 = vadd.xlane.f32.xlu1 %v406_v24 }
 0x31b   : > { %723 = vrot.lane.b32.xlu1 %v1595_v8, %s1457_s15 }
 0x344   : > { %491 = vxpose.xlu1.b32.start.end [1/1] (short) (narrow) %v489_v20, 8 }
 0x37b   : > { %v907_v33 = vpop.trf.xlu0 }
 0x393   : > { %v408_v25 = vpop.xlane.xlu1 %407 }
 0x394   : > { %1336 = vrcp.f32 %v408_v25 }
 0x397   : > { %v724_v30 = vpop.permute.xlu1 %723 }
 0x3a1   : > { %v1337_v26 = vpop.eup %1336 }
 0x3a2   : > { %v410_v27 = vmul.f32 %v1337_v26, %v1335_v23 }
 0x3a4   : > { %1237 = vmatmul.mubr.msk.f32.vlgmr.msra.gmra.mxu1 %vm325_vm2, %v410_v27 }
 0x3a5   : > { %1240 = vmatpush3.msra.mxu1 %v524_v28  ;;  %1241 = vmatprep.mubr.msk.f32.mxu1 %vm1449_vm0, %v1448_v0 }
 0x3a6   : > { %1249 = vmatprep.subr.mxu1 %v1448_v0 }
 0x3c0   : > { %v507_v31 = vpop.trf.xlu1 }
 0x3c1   : > { %1242 = vmatmul.mubr.msk.f32.vlgmr.msra.gmra.mxu1 %vm325_vm2, %v507_v31 }
 0x3c2   : > { %1250 = vmatpush3.msra.mxu1 %v724_v30  ;;  %1251 = vmatprep.mubr.msk.f32.mxu1 %vm1449_vm0, %v1448_v0 }
 0x3c3   : > { %1259 = vmatprep.subr.mxu1 %v1448_v0 }
 0x3c5   : > { %1252 = vmatmul.mubr.msk.f32.vlgmr.msra.gmra.mxu1 %vm325_vm2, %v707_v32 }
 0x3c6   : > { %1260 = vmatpush3.msra.mxu1 %v924_v29  ;;  %1261 = vmatprep.mubr.msk.f32.mxu1 %vm1449_vm0, %v1448_v0 }
 0x3c9   : > { %1262 = vmatmul.mubr.msk.f32.vlgmr.msra.gmra.mxu1 %vm325_vm2, %v907_v33 }
 0x464   : > { %v484_v34 = vpop.f32.mrf.mxu1 }
 0x465   : > { %1088 = vst.msk [vmem:[%s1631_s25] sm:$0xff] %vm325_vm2, %v484_v34 }
 0x466   : > { %v1238_v35 = vpop.f32.mrf.mxu1 }
 0x481   : > { %v595_v36 = vpop.f32.mrf.mxu1 }
 0x482   : > { %v599_v37 = vmul.f32 0.35355338, %v595_v36 }
 0x483   : > { %v1243_v38 = vpop.f32.mrf.mxu1 }
 0x484   : > { %v600_v39 = vsel %vm325_vm2, %v599_v37, -inf }
 0x485   : > { %601 = vmax.xlane.f32.xlu0 %v600_v39  ;;  %v795_v40 = vpop.f32.mrf.mxu1 }
 0x486   : > { %v799_v41 = vmul.f32 0.35355338, %v795_v40 }
 0x487   : > { %v1253_v42 = vpop.f32.mrf.mxu1 }
 0x488   : > { %v800_v43 = vsel %vm325_vm2, %v799_v41, -inf }
 0x489   : > { %801 = vmax.xlane.f32.xlu1 %v800_v43  ;;  %v995_v44 = vpop.f32.mrf.mxu1 }
 0x48a   : > { %v999_v45 = vmul.f32 0.35355338, %v995_v44 }
 0x48b   : > { %v1263_v46 = vpop.f32.mrf.mxu1 }
 0x48c   : > { %v1000_v47 = vsel %vm325_vm2, %v999_v45, -inf }
 0x48d   : > { %1001 = vmax.xlane.f32.xlu0 %v1000_v47 }
 0x50e   : > { %v602_v48 = vpop.xlane.xlu0 %601 }
 0x50f   : > { %v603_v49 = vsub.f32 %v599_v37, %v602_v48 }
 0x511   : > { %v604_v50 = vmul.f32 1.442695, %v603_v49 }
 0x512   : > { %v802_v51 = vpop.xlane.xlu1 %801 }
 0x513   : > { %1338 = vpow2.f32 %v604_v50  ;;  %v803_v52 = vsub.f32 %v799_v41, %v802_v51 }
 0x515   : > { %v804_v53 = vmul.f32 1.442695, %v803_v52 }
 0x516   : > { %v1002_v58 = vpop.xlane.xlu0 %1001 }
 0x517   : > { %1340 = vpow2.f32 %v804_v53  ;;  %v1003_v59 = vsub.f32 %v999_v45, %v1002_v58 }
 0x519   : > { %v1004_v60 = vmul.f32 1.442695, %v1003_v59 }
 0x51b   : > { %1342 = vpow2.f32 %v1004_v60 }
 0x520   : > { %v1339_v54 = vpop.eup %1338 }
 0x521   : > { %v606_v55 = vsel %vm325_vm2, %v1339_v54, 0.0 }
 0x522   : > { %607 = vadd.xlane.f32.xlu1 %v606_v55 }
 0x524   : > { %v1341_v56 = vpop.eup %1340 }
 0x525   : > { %v806_v57 = vsel %vm325_vm2, %v1341_v56, 0.0 }
 0x526   : > { %807 = vadd.xlane.f32.xlu0 %v806_v57 }
 0x528   : > { %v1343_v61 = vpop.eup %1342 }
 0x529   : > { %v1006_v62 = vsel %vm325_vm2, %v1343_v61, 0.0 }
 0x533   : > { %811 = vrot.lane.b32.xlu1 %v1595_v8, %s1458_s16 }
 0x53c   : > { %611 = vrot.lane.b32.xlu0 %v1595_v8, %s1459_s26 }
 0x557   : > { %1007 = vadd.xlane.f32.xlu1 %v1006_v62 }
 0x568   : > { %1011 = vrot.lane.b32.xlu1 %v1595_v8, %s1460_s27 }
 0x5ab   : > { %v608_v63 = vpop.xlane.xlu1 %607 }
 0x5ac   : > { %1344 = vrcp.f32 %v608_v63 }
 0x5af   : > { %v808_v1 = vpop.xlane.xlu0 %807  ;;  %v812_v5 = vpop.permute.xlu1 %811 }
 0x5b0   : > { %1346 = vrcp.f32 %v808_v1 }
 0x5b3   : > { %v612_v2 = vpop.permute.xlu0 %611 }
 0x5b4   : > { %1245 = vmatpush3.xpose.msk.msra.mxu0 %vm325_vm2, %v612_v2 }
 0x5b5   : > { %1254 = vmatprep.subr.mxu0 %v1448_v0 }
 0x5b9   : > { %v1345_v3 = vpop.eup %1344 }
 0x5ba   : > { %v610_v4 = vmul.f32 %v1345_v3, %v1339_v54 }
 0x5bc   : > { %1247 = vmatmul.mubr.msk.f32.vlgmr.msra.gmra.mxu0 %vm325_vm2, %v610_v4 }
 0x5bd   : > { %v1347_v6 = vpop.eup %1346  ;;  %1255 = vmatpush3.xpose.msk.msra.mxu0 %vm325_vm2, %v812_v5  ;;  %1256 = vmatprep.mubr.msk.f32.mxu0 %vm1449_vm0, %v1448_v0 }
 0x5be   : > { %v810_v7 = vmul.f32 %v1347_v6, %v1341_v56  ;;  %1264 = vmatprep.subr.mxu0 %v1448_v0 }
 0x5c0   : > { %1257 = vmatmul.mubr.msk.f32.vlgmr.msra.gmra.mxu0 %vm325_vm2, %v810_v7 }
 0x5c1   : > { %1266 = vmatprep.mubr.msk.f32.mxu0 %vm1449_vm0, %v1448_v0 }
 0x5e0   : > { %v1008_v8 = vpop.xlane.xlu1 %1007 }
 0x5e1   : > { %1348 = vrcp.f32 %v1008_v8 }
 0x5e4   : > { %v1012_v9 = vpop.permute.xlu1 %1011 }
 0x5e5   : > { %1265 = vmatpush3.xpose.msk.msra.mxu0 %vm325_vm2, %v1012_v9 }
 0x5ee   : > { %v1349_v10 = vpop.eup %1348 }
 0x5ef   : > { %v1010_v11 = vmul.f32 %v1349_v10, %v1343_v61 }
 0x5f1   : > { %1267 = vmatmul.mubr.msk.f32.vlgmr.msra.gmra.mxu0 %vm325_vm2, %v1010_v11 }
 0x67c   : > { %v684_v12 = vpop.f32.mrf.mxu0 }
 0x67d   : > { %1089 = vst.msk [vmem:[%s1631_s25 + $0x8] sm:$0xff] %vm325_vm2, %v684_v12 }
 0x67e   : > { %v1248_v13 = vpop.f32.mrf.mxu0 }
 0x680   : > { %v884_v14 = vpop.f32.mrf.mxu0 }
 0x681   : > { %1090 = vst.msk [vmem:[%s1631_s25 + $0x10] sm:$0xff] %vm325_vm2, %v884_v14 }
 0x682   : > { %v1258_v15 = vpop.f32.mrf.mxu0 }
 0x6b1   : > { %v1084_v16 = vpop.f32.mrf.mxu0 }
 0x6b2   : > { %1091 = vst.msk [vmem:[%s1631_s25 + $0x18] sm:$0xff] %vm325_vm2, %v1084_v16 }
 0x6b3   : > { %v1268_v0 = vpop.f32.mrf.mxu0 }
 0x6b4 PF: > { %p14_p7 = scmp.ge.s32.totalorder %s1525_s22, 4   ;;  %s1690_s12 = smov %s1434_s13 }
 0x6b5   : > { %s1691_s13 = smov %s1438_s14  ;;  %s1692_s14 = smov %s1542_s30 }
 0x6b6   : > { %s1693_s15 = smov %s1525_s22  ;;  %16 = sbr.rel (!%p14_p7) target bundleno = 4 (0x4), region = 76 }
 0x6bb   :  { %1113 = vsyncpa [#allocation3], 1 }
 0x6bc   :  { %1115 = vsyncpa [#allocation3 + $0x1], 1 }
 0x6bd   :  { %1116 = vsyncpa [#allocation5], 1 }

</bundles_post_ra>
